<compile_context>
chip_gen: v6e
topology: v6e:2x2x1
jax: 0.10.0
libtpu: 0.0.40
codegen_flags: <defaults>
</compile_context>

<pallas_src>
import math

import jax
import jax.numpy as jnp
from jax.experimental import pallas as pl
from jax.experimental.pallas import tpu as pltpu


def _round_up(x, n):
    return ((x + n - 1) // n) * n


def _lora_kernel(x_ref, a_ref, b_ref, o_ref, xa_ref):
    """One (tm, tn) output tile of  y = (x @ A) @ (alpha*B)."""
    # x @ A depends only on the row tile (grid axis 0): compute it once per
    # row tile (innermost grid index j == 0) into VMEM scratch and reuse it
    # for every out_dim tile.  Both matmuls run on the MXU with f32 acc.
    @pl.when(pl.program_id(1) == 0)
    def _():
        xa_ref[...] = jnp.dot(x_ref[...], a_ref[...],
                              preferred_element_type=jnp.float32)

    o_ref[...] = jnp.dot(xa_ref[...], b_ref[...],
                         preferred_element_type=jnp.float32).astype(o_ref.dtype)


def lora_layer(x, A, B, alpha, *, tm_max=256, tn_max=512):
    """alpha * (x @ A @ B); x: (..., in_dim), A: (in_dim, rank), B: (rank, out_dim)."""
    *lead, in_dim = x.shape
    rank, out_dim = B.shape
    assert A.shape == (in_dim, rank)

    m = int(math.prod(lead)) if lead else 1
    x2d = x.reshape(m, in_dim)

    # Fold alpha into B once (removes the per-tile VPU multiply in the kernel).
    b_scaled = jnp.asarray(alpha, B.dtype) * B

    # --- tile sizes (lane/sublane friendly) --------------------------------
    tm = min(tm_max, _round_up(m, 8))           # rows per tile, multiple of 8
    tn = min(tn_max, _round_up(out_dim, 128))   # out cols per tile, multiple of 128

    m_p = _round_up(m, tm)
    n_p = _round_up(out_dim, tn)

    if m_p != m:
        x2d = jnp.pad(x2d, ((0, m_p - m), (0, 0)))
    if n_p != out_dim:
        b_scaled = jnp.pad(b_scaled, ((0, 0), (0, n_p - out_dim)))

    grid = (m_p // tm, n_p // tn)

    itemsize = jnp.dtype(x.dtype).itemsize
    cost = pl.CostEstimate(
        flops=2 * m_p * rank * (in_dim + n_p),
        transcendentals=0,
        bytes_accessed=itemsize * (m_p * in_dim + in_dim * rank
                                   + rank * n_p + m_p * n_p),
    )

    out2d = pl.pallas_call(
        _lora_kernel,
        out_shape=jax.ShapeDtypeStruct((m_p, n_p), x.dtype),
        grid_spec=pltpu.PrefetchScalarGridSpec(
            num_scalar_prefetch=0,
            grid=grid,
            in_specs=[
                pl.BlockSpec((tm, in_dim), lambda i, j: (i, 0)),    # x row tile
                pl.BlockSpec((in_dim, rank), lambda i, j: (0, 0)),  # A (resident)
                pl.BlockSpec((rank, tn), lambda i, j: (0, j)),      # alpha*B col tile
            ],
            out_specs=pl.BlockSpec((tm, tn), lambda i, j: (i, j)),
            scratch_shapes=[pltpu.VMEM((tm, rank), jnp.float32)],   # x @ A carry
        ),
        compiler_params=pltpu.CompilerParams(
            dimension_semantics=("parallel", "arbitrary")),
        cost_estimate=cost,
    )(x2d, A, b_scaled)

    return out2d[:m, :out_dim].reshape(*lead, out_dim)


if __name__ == "__main__":
    def run_case(key, batch, seq, in_dim, out_dim, rank, alpha, **kw):
        kx, ka, kb = jax.random.split(key, 3)
        x = jax.random.normal(kx, (batch, seq, in_dim), dtype=jnp.float32)
        # LoRALayer init: A ~ kaiming_uniform_(a=sqrt(5)) on (in_dim, rank)
        #   -> uniform(-sqrt(1/rank), sqrt(1/rank)).  B is zeros in the module;
        # use small nonzero B here so the path is numerically exercised
        # (forward semantics are identical).
        a_bound = math.sqrt(1.0 / rank)
        A = jax.random.uniform(ka, (in_dim, rank), minval=-a_bound,
                               maxval=a_bound, dtype=jnp.float32)
        B = 0.01 * jax.random.normal(kb, (rank, out_dim), dtype=jnp.float32)

        out = jax.block_until_ready(lora_layer(x, A, B, alpha, **kw))

        # Pure-JAX reference of the PyTorch forward: alpha * (x @ A @ B).
        ref = alpha * ((x @ A) @ B)
        assert out.shape == ref.shape
        assert jnp.allclose(out, ref, atol=1e-5, rtol=1e-5), "mismatch vs reference"

    key = jax.random.PRNGKey(0)
    k1, k2, k3 = jax.random.split(key, 3)
    # Lane-aligned shapes (no padding needed).
    run_case(k1, batch=2, seq=8, in_dim=64, out_dim=128, rank=4, alpha=2.0)
    # Ragged shapes: exercises M padding (14 -> 16) and out_dim padding (96 -> 128).
    run_case(k2, batch=2, seq=7, in_dim=48, out_dim=96, rank=4, alpha=0.5)
    # Multiple out_dim tiles (tn_max=128 -> 2 j-steps): exercises the x@A
    # scratch-carry path across the "arbitrary" grid axis.
    run_case(k3, batch=2, seq=8, in_dim=64, out_dim=256, rank=8, alpha=1.5,
             tn_max=128)

    print("KERNEL_OK")
</pallas_src>

<mosaic_0001>
module attributes {stable_mosaic.version = 11 : i64} {
  func.func @_lora_kernel(%arg0: i32, %arg1: i32, %arg2: memref<16x64xf32, #tpu.memory_space<vmem>>, %arg3: memref<64x4xf32, #tpu.memory_space<vmem>>, %arg4: memref<4x128xf32, #tpu.memory_space<vmem>>, %arg5: memref<16x128xf32, #tpu.memory_space<vmem>>, %arg6: memref<16x4xf32, #tpu.memory_space<vmem>>) attributes {dimension_semantics = [#tpu.dimension_semantics<parallel>, #tpu.dimension_semantics<arbitrary>], iteration_bounds = array<i64: 1, 1>, scalar_prefetch = 0 : i64, scratch_operands = 1 : i64, tpu.core_type = #tpu.core_type<tc>, window_params = [{transform_indices = @transform_0, window_bounds = array<i64: 16, 64>}, {pipeline_mode = #tpu.pipeline_mode<synchronous>, transform_indices = @transform_1, window_bounds = array<i64: 64, 4>}, {transform_indices = @transform_2, window_bounds = array<i64: 4, 128>}, {transform_indices = @transform_3, window_bounds = array<i64: 16, 128>}]} {
    %c0_i32 = arith.constant 0 : i32
    %0 = arith.cmpi eq, %arg1, %c0_i32 : i32
    %1 = arith.extui %0 : i1 to i32
    %c0_i32_0 = arith.constant 0 : i32
    %2 = arith.cmpi ne, %1, %c0_i32_0 : i32
    scf.if %2 {
      %c0_6 = arith.constant 0 : index
      %c0_7 = arith.constant 0 : index
      %7 = vector.load %arg2[%c0_6, %c0_7] : memref<16x64xf32, #tpu.memory_space<vmem>>, vector<16x64xf32>
      %c0_8 = arith.constant 0 : index
      %c0_9 = arith.constant 0 : index
      %8 = vector.load %arg3[%c0_8, %c0_9] : memref<64x4xf32, #tpu.memory_space<vmem>>, vector<64x4xf32>
      %cst_10 = arith.constant dense<0.000000e+00> : vector<16x4xf32>
      %9 = tpu.matmul %7, %8, %cst_10 {dimension_numbers = #tpu.dot_dimension_numbers<[1], [0], [0], [1], [0, 0, 1, 1], [], []>} : vector<16x64xf32>, vector<64x4xf32>, vector<16x4xf32> -> vector<16x4xf32>
      %c0_11 = arith.constant 0 : index
      %c0_12 = arith.constant 0 : index
      %10 = vector.load %arg6[%c0_11, %c0_12] : memref<16x4xf32, #tpu.memory_space<vmem>>, vector<16x4xf32>
      tpu.vector_store %arg6[%c0_11, %c0_12], %9 {strides = array<i32>} : memref<16x4xf32, #tpu.memory_space<vmem>>, vector<16x4xf32>,
    } else {
    }
    %c0 = arith.constant 0 : index
    %c0_1 = arith.constant 0 : index
    %3 = vector.load %arg6[%c0, %c0_1] : memref<16x4xf32, #tpu.memory_space<vmem>>, vector<16x4xf32>
    %c0_2 = arith.constant 0 : index
    %c0_3 = arith.constant 0 : index
    %4 = vector.load %arg4[%c0_2, %c0_3] : memref<4x128xf32, #tpu.memory_space<vmem>>, vector<4x128xf32>
    %cst = arith.constant dense<0.000000e+00> : vector<16x128xf32>
    %5 = tpu.matmul %3, %4, %cst {dimension_numbers = #tpu.dot_dimension_numbers<[1], [0], [0], [1], [0, 0, 1, 1], [], []>} : vector<16x4xf32>, vector<4x128xf32>, vector<16x128xf32> -> vector<16x128xf32>
    %c0_4 = arith.constant 0 : index
    %c0_5 = arith.constant 0 : index
    %6 = vector.load %arg5[%c0_4, %c0_5] : memref<16x128xf32, #tpu.memory_space<vmem>>, vector<16x128xf32>
    tpu.vector_store %arg5[%c0_4, %c0_5], %5 {strides = array<i32>} : memref<16x128xf32, #tpu.memory_space<vmem>>, vector<16x128xf32>,
    return
  }
  func.func @transform_0(%arg0: i32, %arg1: i32) -> (i32, i32) {
    %c0_i32 = arith.constant 0 : i32
    %c0_i32_0 = arith.constant 0 : i32
    return %arg0, %c0_i32 : i32, i32
  }
  func.func @transform_1(%arg0: i32, %arg1: i32) -> (i32, i32) {
    %c0_i32 = arith.constant 0 : i32
    %c0_i32_0 = arith.constant 0 : i32
    %c0_i32_1 = arith.constant 0 : i32
    return %c0_i32, %c0_i32_0 : i32, i32
  }
  func.func @transform_2(%arg0: i32, %arg1: i32) -> (i32, i32) {
    %c0_i32 = arith.constant 0 : i32
    %c0_i32_0 = arith.constant 0 : i32
    return %c0_i32, %arg1 : i32, i32
  }
  func.func @transform_3(%arg0: i32, %arg1: i32) -> (i32, i32) {
    %c0_i32 = arith.constant 0 : i32
    return %arg0, %arg1 : i32, i32
  }
}

</mosaic_0001>

<bundles_post_ra>
// kernel: tpu_custom_call.1
= control target key start
LH: loop header
LB: loop body
LE: loop exit
PB: predicated region body
PF: predicated region fallthrough
CT: control target
= control target key end

     0   :  { %vm29_vm0 = vcmask 523264   ;;  %s349_s0 = inlined_call_operand.vmem [shape: f32[16,64], index: 0, kind: input, shape index: {}]   ;;  %s350_s1 = inlined_call_operand.vmem [shape: f32[64,4], index: 1, kind: input, shape index: {}]   ;;  %s351_s2 = inlined_call_operand.vmem [shape: f32[4,128], index: 2, kind: input, shape index: {}]   ;;  %s352_s3 = inlined_call_operand.hbm [shape: f32[16,128], index: 3, kind: output, shape index: {}]  }
   0x1   :  { %v28_v0 = vld [vmem:[%s350_s1 + $0x38] sm:$0xff]  ;;  %v27_v1 = vld [vmem:[%s350_s1 + $0x30] sm:$0xff]  ;;  %v26_v2 = vld [vmem:[%s350_s1 + $0x28] sm:$0xff] }
   0x2   :  { %239 = vmatprep.subr.mxu0 %v28_v0  ;;  %v19_v3 = vld [vmem:[%s349_s0] sm:$0xff] }
   0x3   :  { %240 = vmatpush3.msra.mxu0 %v28_v0  ;;  %255 = vmatprep.mubr.msk.f32.mxu0 %vm29_vm0, %v19_v3 }
   0x4   :  { %241 = vmatprep.subr.mxu0 %v27_v1 }
   0x5   :  { %8 = vsyncpa [#allocation4], 0  ;;  %242 = vmatpush3.msra.mxu0 %v27_v1  ;;  %v25_v4 = vld [vmem:[%s350_s1 + $0x20] sm:$0xff]  ;;  %v24_v5 = vld [vmem:[%s350_s1 + $0x18] sm:$0xff]  ;;  %vm124_vm1 = vcmask 1043456   ;;  %vm111_vm2 = vcmask 31744  }
   0x6   :  { %243 = vmatprep.subr.mxu0 %v26_v2  ;;  %v23_v6 = vld [vmem:[%s350_s1 + $0x10] sm:$0xff]  ;;  %v22_v7 = vld [vmem:[%s350_s1 + $0x8] sm:$0xff]  ;;  %v21_v8 = vld [vmem:[%s350_s1] sm:$0xff] }
   0x7   :  { %244 = vmatpush3.msra.mxu0 %v26_v2  ;;  %v20_v9 = vld [vmem:[%s349_s0 + $0x8] sm:$0xff]  ;;  %v116_v10 = vld [vmem:[%s351_s2] sm:$0xf]  ;;  %s288_s0 = smov [#allocation3]  }
   0x8   :  { %245 = vmatprep.subr.mxu0 %v25_v4  ;;  %258 = vmatprep.subr.msk.mxu1 %vm124_vm1, %v116_v10  ;;  %s210_s1 = sshll.u32 %s288_s0, 4  ;;  %s211_s1 = int_to_ptr.vmem [resolvable:$true] %s210_s1 }
   0x9   :  { %246 = vmatpush3.msra.mxu0 %v25_v4  ;;  %259 = vmatpush3.msk.msra.mxu1 %vm124_vm1, %v116_v10  ;;  %s266_s2 = scalar_lea.vmem %s211_s1, 256  ;;  %p271_p1 = scmp.lt.s32.totalorder %s211_s1, %s211_s1 }
   0xa   :  { %247 = vmatprep.subr.mxu0 %v24_v5  ;;  %p267_p0 = scmp.ne.s32.totalorder %s211_s1, %s266_s2  ;;  %p272_p2 = scmp.lt.s32.totalorder %s266_s2, %s266_s2 }
   0xb   :  { %248 = vmatpush3.msra.mxu0 %v24_v5 }
   0xc   :  { %249 = vmatprep.subr.mxu0 %v23_v6  ;;  %p273_p3 = por %p272_p2, %p271_p1 }
   0xd   :  { %250 = vmatpush3.msra.mxu0 %v23_v6 }
   0xe   :  { %251 = vmatprep.subr.mxu0 %v22_v7  ;;  %p274_p4 = pnand %p273_p3, %p267_p0 }
   0xf   :  { %252 = vmatpush3.msra.mxu0 %v22_v7 }
  0x10   :  { %253 = vmatprep.subr.mxu0 %v21_v8 }
  0x11   :  { %254 = vmatpush3.msra.mxu0 %v21_v8 }
  0x12   :  { %256 = vmatmul.mubr.msk.f32.vlgmr.msra.gmra.mxu0 %vm29_vm0, %v20_v9 }
  0xd2   :  { %v257_v11 = vpop.f32.mrf.mxu0 }
  0xd3   :  { %113 = vst.msk [vmem:[#allocation2 + $0x8] sm:$0xff] %vm111_vm2, %v257_v11 }
  0xd4   :  { %v102_v12 = vpop.f32.mrf.mxu0 }
  0xd5   :  { %112 = vst.msk [vmem:[#allocation2] sm:$0xff] %vm111_vm2, %v102_v12 }
  0xda   :  { %v115_v14 = vld [vmem:[#allocation2 + $0x8] sm:$0xff] }
  0xdc   :  { %v114_v13 = vld [vmem:[#allocation2] sm:$0xff] }
  0xdd   :  { %260 = vmatprep.mubr.msk.f32.mxu1 %vm111_vm2, %v114_v13 }
  0xde   :  { %261 = vmatmul.mubr.msk.f32.vlgmr.msra.gmra.mxu1 %vm111_vm2, %v115_v14 }
 0x19e   :  { %v262_v15 = vpop.f32.mrf.mxu1 }
 0x19f   :  { %204 = vst [vmem:[#allocation3 + $0x8] sm:$0xff] %v262_v15 }
 0x1a0   :  { %v194_v16 = vpop.f32.mrf.mxu1 }
 0x1a1   :  { %203 = vst [vmem:[#allocation3] sm:$0xff] %v194_v16 }
 0x1a2   :  { %277 = shalt.err (!%p274_p4)
}
 0x1a3   :  { %s289_s7 = smov 128   ;;  %s290_s8 = smov 8  }
 0x1a4   :  { %216 = dma.vmem_to_hbm [thread:$0]  %s211_s1, 256, %s352_s3, [#allocation4], %s289_s7, %s289_s7, %s290_s8  }
 0x1a5   :  { %286 = dma.done.wait [#allocation4], 256  }
 0x1a6   :  { %287 = vsyncadd [#allocation4], 4294967040 }
 0x1a7   :  { %220 = vsyncpa [#allocation4], 1 }

</bundles_post_ra>
